<compile_context>
chip_gen: v7x
topology: tpu7x:2x2x1
jax: 0.10.0
libtpu: 0.0.40
codegen_flags: <defaults>
</compile_context>

<pallas_src>
import functools

import jax
import jax.numpy as jnp
from jax.experimental import pallas as pl
from jax.experimental.pallas import tpu as pltpu


# ----------------------------------------------------------------------------
# elementwise helpers (VPU/EUP)
# ----------------------------------------------------------------------------
def _erf(x):
    # Abramowitz & Stegun 7.1.26 (max abs err 1.5e-7)
    a1, a2, a3, a4, a5 = 0.254829592, -0.284496736, 1.421413741, -1.453152027, 1.061405429
    p = 0.3275911
    sgn = jnp.where(x >= 0.0, 1.0, -1.0)
    ax = jnp.abs(x)
    t = 1.0 / (1.0 + p * ax)
    poly = ((((a5 * t + a4) * t + a3) * t + a2) * t + a1) * t
    return sgn * (1.0 - poly * jnp.exp(-ax * ax))


def _gelu(x):
    return 0.5 * x * (1.0 + _erf(x * 0.7071067811865476))


# ----------------------------------------------------------------------------
# fused per-layer kernel: GraphConv + GELU + masked BatchNorm + TopKPooling + readout (+ Linear at
# the last layer).  grid axis = layer index; h / mask / readout-accumulator persist in VMEM scratch.
# ----------------------------------------------------------------------------
def fused_layer_kernel(a_ref, same_ref, x_ref, oh_ref, w_ref, b_ref, gam_ref, bet_ref,
                       pw_ref, wlin_ref, blin_ref, o_ref, h_sc, m_sc, acc_sc,
                       *, ratio, num_graphs):
    l = pl.program_id(0)
    N, H = h_sc.shape

    @pl.when(l == 0)
    def _init():
        h_sc[...] = x_ref[...]                       # zero-padded input features
        m_sc[...] = jnp.ones_like(m_sc)              # all nodes active
        acc_sc[...] = jnp.zeros_like(acc_sc)         # readout accumulator

    m = m_sc[...]                                    # [N,1] active mask
    xm = h_sc[...] * m                               # zero out pooled-away source nodes

    # ---- GraphConv (add aggregation), merged into a single K=2H matmul ----
    a = a_ref[...].astype(jnp.float32)               # bf16 adjacency -> f32 (entries exact ints)
    agg = jnp.dot(a, xm, preferred_element_type=jnp.float32)          # sum_j x_j  [N,H]
    feat = jnp.concatenate([agg, xm], axis=1)                          # [N,2H]
    h = jnp.dot(feat, w_ref[0], preferred_element_type=jnp.float32) + b_ref[0]
    h = _gelu(h)

    # ---- masked BatchNorm (training statistics over active nodes) ----
    cnt = jnp.maximum(jnp.sum(m), 1.0)
    mean = jnp.sum(h * m, axis=0, keepdims=True) / cnt
    diff = (h - mean) * m
    var = jnp.sum(diff * diff, axis=0, keepdims=True) / cnt            # biased, masked
    h = gam_ref[0] * (h - mean) * jax.lax.rsqrt(var + 1e-5) + bet_ref[0]

    # ---- TopKPooling: score = tanh(x.w/||w||), keep top ceil(ratio*n) per graph ----
    w_row = pw_ref[0]                                                  # [1,H]
    wnorm = jnp.sqrt(jnp.sum(w_row * w_row))
    s = jnp.tanh(jnp.sum(h * w_row, axis=1, keepdims=True) / wnorm)    # [N,1]
    s_act = jnp.where(m > 0.5, s, -3.0)              # push inactive nodes below tanh range
    s_row = jnp.transpose(s_act)                     # [1,N]  (bit-identical to s_act)

    ii = jax.lax.broadcasted_iota(jnp.int32, (N, N), 0)   # self index
    jj = jax.lax.broadcasted_iota(jnp.int32, (N, N), 1)   # other index
    beats = (jj != ii) & ((s_row > s_act) | ((s_row == s_act) & (jj < ii)))
    sel = jnp.where(beats, same_ref[...], 0.0)                         # same-graph & beats
    ones_col = jnp.ones((N, 1), jnp.float32)
    rank = jnp.dot(sel, ones_col, preferred_element_type=jnp.float32)  # [N,1] (MXU reduce)
    n_act = jnp.dot(same_ref[...], m, preferred_element_type=jnp.float32)   # active in my graph
    k = jnp.ceil(ratio * n_act)
    new_m = m * (rank < k).astype(jnp.float32)
    xo = h * s                                                          # scale kept feats by score

    h_sc[...] = xo
    m_sc[...] = new_m

    # ---- readout: global max / mean over kept nodes, per graph (B is small & static) ----
    for b in range(num_graphs):
        g_b = oh_ref[:, b:b + 1] * new_m                               # [N,1] kept & in graph b
        mx = jnp.max(jnp.where(g_b > 0.5, xo, -1e30), axis=0, keepdims=True)   # [1,H]
        cnt_b = jnp.maximum(jnp.sum(g_b), 1.0)
        mean_b = jnp.sum(xo * g_b, axis=0, keepdims=True) / cnt_b              # [1,H]
        acc_sc[b:b + 1, 0:H] = acc_sc[b:b + 1, 0:H] + mx
        acc_sc[b:b + 1, H:2 * H] = acc_sc[b:b + 1, H:2 * H] + mean_b

    # ---- final Linear on the accumulated readout ----
    @pl.when(l == pl.num_programs(0) - 1)
    def _final():
        o_ref[...] = (jnp.dot(acc_sc[...], wlin_ref[...],
                              preferred_element_type=jnp.float32) + blin_ref[...])


# ----------------------------------------------------------------------------
# Full forward: one fused pallas_call for all 4 layers + linear
# ----------------------------------------------------------------------------
@functools.partial(jax.jit, static_argnames=("num_graphs", "ratio"))
def gcn_topk4_forward(params, x, edge_index, batch, num_graphs, ratio=0.5):
    N, FIN = x.shape
    H = params["conv1"]["wrel"].shape[1]
    OUT = params["linear"]["w"].shape[1]
    assert FIN <= H, "input feature dim must be <= hidden (pad scheme)"
    src, dst = edge_index[0], edge_index[1]

    # dense adjacency built ONCE; bf16 (entries are small exact integers)
    A = jnp.zeros((N, N), jnp.float32).at[dst, src].add(1.0).astype(jnp.bfloat16)
    same = (batch[:, None] == batch[None, :]).astype(jnp.float32)      # [N,N] same-graph
    onehot = jax.nn.one_hot(batch, num_graphs, dtype=jnp.float32)      # [N,B] membership (col)
    x_pad = jnp.zeros((N, H), jnp.float32).at[:, :FIN].set(x)          # zero-pad features to H

    # stack per-layer params; layer-1 weights zero-padded along the (unused) input rows
    w_merged, b_st, gam_st, bet_st, pw_st = [], [], [], [], []
    for l in range(1, 5):
        cp, bp, pp = params[f"conv{l}"], params[f"bn{l}"], params[f"pool{l}"]
        d = cp["wrel"].shape[0]
        wrel = jnp.zeros((H, H), jnp.float32).at[:d, :].set(cp["wrel"])
        wroot = jnp.zeros((H, H), jnp.float32).at[:d, :].set(cp["wroot"])
        w_merged.append(jnp.concatenate([wrel, wroot], axis=0))        # [2H,H]
        b_st.append(cp["brel"])
        gam_st.append(bp["gamma"])
        bet_st.append(bp["beta"])
        pw_st.append(pp["w"])
    w_st = jnp.stack(w_merged)                                         # [4,2H,H]
    b_st = jnp.stack(b_st)                                             # [4,1,H]
    gam_st = jnp.stack(gam_st)
    bet_st = jnp.stack(bet_st)
    pw_st = jnp.stack(pw_st)

    flops = int(4 * (2 * N * N * H + 2 * N * (2 * H) * H + 2 * N * N * 3)
                + 2 * num_graphs * (2 * H) * OUT)
    transcendentals = int(4 * (N * H + N))
    bytes_accessed = int(2 * N * N + 4 * N * N + 4 * N * H + 4 * N * num_graphs
                         + 4 * 4 * (2 * H * H + 4 * H) + 4 * (2 * H * OUT + OUT)
                         + 4 * num_graphs * OUT)

    kern = functools.partial(fused_layer_kernel, ratio=float(ratio), num_graphs=num_graphs)
    return pl.pallas_call(
        kern,
        out_shape=jax.ShapeDtypeStruct((num_graphs, OUT), jnp.float32),
        grid=(4,),
        in_specs=[
            pl.BlockSpec((N, N), lambda l: (0, 0)),              # A (bf16, resident)
            pl.BlockSpec((N, N), lambda l: (0, 0)),              # same-graph matrix
            pl.BlockSpec((N, H), lambda l: (0, 0)),              # x (padded)
            pl.BlockSpec((N, num_graphs), lambda l: (0, 0)),     # one-hot membership (col)
            pl.BlockSpec((1, 2 * H, H), lambda l: (l, 0, 0)),    # merged conv weight
            pl.BlockSpec((1, 1, H), lambda l: (l, 0, 0)),        # conv bias
            pl.BlockSpec((1, 1, H), lambda l: (l, 0, 0)),        # bn gamma
            pl.BlockSpec((1, 1, H), lambda l: (l, 0, 0)),        # bn beta
            pl.BlockSpec((1, 1, H), lambda l: (l, 0, 0)),        # pool weight
            pl.BlockSpec((2 * H, OUT), lambda l: (0, 0)),        # linear W
            pl.BlockSpec((1, OUT), lambda l: (0, 0)),            # linear b
        ],
        out_specs=pl.BlockSpec((num_graphs, OUT), lambda l: (0, 0)),
        scratch_shapes=[
            pltpu.VMEM((N, H), jnp.float32),                     # h (node features)
            pltpu.VMEM((N, 1), jnp.float32),                     # active mask
            pltpu.VMEM((num_graphs, 2 * H), jnp.float32),        # readout accumulator
        ],
        compiler_params=pltpu.CompilerParams(
            dimension_semantics=("arbitrary",),
            vmem_limit_bytes=32 * 1024 * 1024),
        cost_estimate=pl.CostEstimate(flops=flops, transcendentals=transcendentals,
                                      bytes_accessed=bytes_accessed),
    )(A, same, x_pad, onehot, w_st, b_st, gam_st, bet_st, pw_st,
      params["linear"]["w"], params["linear"]["b"])


# ----------------------------------------------------------------------------
# deterministic parameter init (shapes per module __init__; synthetic, no checkpoint)
# ----------------------------------------------------------------------------
def init_params(key, fin, hidden, out):
    keys = jax.random.split(key, 16)

    def lin_w(k, i, o):
        return jax.random.normal(k, (i, o), jnp.float32) / jnp.sqrt(jnp.float32(i))

    params = {}
    dims = [fin, hidden, hidden, hidden]
    ki = 0
    for l in range(4):
        params[f"conv{l + 1}"] = {
            "wrel": lin_w(keys[ki], dims[l], hidden),        # lin_rel.weight^T
            "wroot": lin_w(keys[ki + 1], dims[l], hidden),   # lin_root.weight^T (no bias)
            "brel": jnp.zeros((1, hidden), jnp.float32),     # lin_rel.bias
        }
        params[f"bn{l + 1}"] = {"gamma": jnp.ones((1, hidden), jnp.float32),
                                "beta": jnp.zeros((1, hidden), jnp.float32)}
        params[f"pool{l + 1}"] = {"w": 0.1 * jax.random.normal(keys[ki + 2], (1, hidden),
                                                               jnp.float32)}
        ki += 3
    params["linear"] = {"w": lin_w(keys[ki], 2 * hidden, out),
                        "b": jnp.zeros((1, out), jnp.float32)}
    return params


if __name__ == "__main__":
    key = jax.random.PRNGKey(0)
    kx, kp = jax.random.split(key)

    N, FIN, HID, OUT, B = 16, 8, 32, 32, 2       # 2 graphs x 8 nodes
    x = jax.random.normal(kx, (N, FIN), jnp.float32)

    # bidirectional ring edges inside each graph (edge_attr unused by the forward pass)
    srcs, dsts = [], []
    for g in range(B):
        base = g * 8
        for i in range(8):
            srcs += [base + i, base + (i + 1) % 8]
            dsts += [base + (i + 1) % 8, base + i]
    edge_index = jnp.array([srcs, dsts], dtype=jnp.int32)
    batch = jnp.repeat(jnp.arange(B, dtype=jnp.int32), 8)

    params = init_params(kp, FIN, HID, OUT)
    out = gcn_topk4_forward(params, x, edge_index, batch, num_graphs=B, ratio=0.5)
    jax.block_until_ready(out)
    assert out.shape == (B, OUT)
    print("KERNEL_OK")
</pallas_src>

<mosaic_0001>
module attributes {stable_mosaic.version = 11 : i64} {
  func.func private @main(%arg0: i32) attributes {dimension_semantics = [#tpu.dimension_semantics<core_parallel>], iteration_bounds = array<i64: 2>, tpu.core_type = #tpu.core_type<sc_scalar_subcore>, window_params = []} {
    return
  }
}

module attributes {stable_mosaic.version = 11 : i64} {
  func.func private @main(%arg0: i32) attributes {dimension_semantics = [#tpu.dimension_semantics<core_parallel>], iteration_bounds = array<i64: 2>, tpu.core_type = #tpu.core_type<sc_scalar_subcore>, window_params = []} {
    return
  }
}

module attributes {stable_mosaic.version = 11 : i64} {
  func.func @fused_layer_kernel(%arg0: i32, %arg1: memref<16x16xbf16, #tpu.memory_space<vmem>>, %arg2: memref<16x16xf32, #tpu.memory_space<vmem>>, %arg3: memref<16x32xf32, #tpu.memory_space<vmem>>, %arg4: memref<16x2xf32, #tpu.memory_space<vmem>>, %arg5: memref<1x64x32xf32, #tpu.memory_space<vmem>>, %arg6: memref<1x1x32xf32, #tpu.memory_space<vmem>>, %arg7: memref<1x1x32xf32, #tpu.memory_space<vmem>>, %arg8: memref<1x1x32xf32, #tpu.memory_space<vmem>>, %arg9: memref<1x1x32xf32, #tpu.memory_space<vmem>>, %arg10: memref<64x32xf32, #tpu.memory_space<vmem>>, %arg11: memref<1x32xf32, #tpu.memory_space<vmem>>, %arg12: memref<2x32xf32, #tpu.memory_space<vmem>>, %arg13: memref<16x32xf32, #tpu.memory_space<vmem>>, %arg14: memref<16x1xf32, #tpu.memory_space<vmem>>, %arg15: memref<2x64xf32, #tpu.memory_space<vmem>>) attributes {dimension_semantics = [#tpu.dimension_semantics<arbitrary>], iteration_bounds = array<i64: 4>, scalar_prefetch = 0 : i64, scratch_operands = 3 : i64, tpu.core_type = #tpu.core_type<tc>, window_params = [{pipeline_mode = #tpu.pipeline_mode<synchronous>, transform_indices = @transform_0, window_bounds = array<i64: 16, 16>}, {pipeline_mode = #tpu.pipeline_mode<synchronous>, transform_indices = @transform_1, window_bounds = array<i64: 16, 16>}, {pipeline_mode = #tpu.pipeline_mode<synchronous>, transform_indices = @transform_2, window_bounds = array<i64: 16, 32>}, {pipeline_mode = #tpu.pipeline_mode<synchronous>, transform_indices = @transform_3, window_bounds = array<i64: 16, 2>}, {transform_indices = @transform_4, window_bounds = array<i64: 1, 64, 32>}, {transform_indices = @transform_5, window_bounds = array<i64: 1, 1, 32>}, {transform_indices = @transform_6, window_bounds = array<i64: 1, 1, 32>}, {transform_indices = @transform_7, window_bounds = array<i64: 1, 1, 32>}, {transform_indices = @transform_8, window_bounds = array<i64: 1, 1, 32>}, {pipeline_mode = #tpu.pipeline_mode<synchronous>, transform_indices = @transform_9, window_bounds = array<i64: 64, 32>}, {pipeline_mode = #tpu.pipeline_mode<synchronous>, transform_indices = @transform_10, window_bounds = array<i64: 1, 32>}, {pipeline_mode = #tpu.pipeline_mode<synchronous>, transform_indices = @transform_11, window_bounds = array<i64: 2, 32>}]} {
    %c0_i32 = arith.constant 0 : i32
    %0 = arith.cmpi eq, %arg0, %c0_i32 : i32
    %1 = arith.extui %0 : i1 to i32
    %c0_i32_0 = arith.constant 0 : i32
    %2 = arith.cmpi ne, %1, %c0_i32_0 : i32
    scf.if %2 {
      %c0_91 = arith.constant 0 : index
      %c0_92 = arith.constant 0 : index
      %202 = vector.load %arg3[%c0_91, %c0_92] : memref<16x32xf32, #tpu.memory_space<vmem>>, vector<16x32xf32>
      %c0_93 = arith.constant 0 : index
      %c0_94 = arith.constant 0 : index
      %203 = vector.load %arg13[%c0_93, %c0_94] : memref<16x32xf32, #tpu.memory_space<vmem>>, vector<16x32xf32>
      tpu.vector_store %arg13[%c0_93, %c0_94], %202 {strides = array<i32>} : memref<16x32xf32, #tpu.memory_space<vmem>>, vector<16x32xf32>,
      %cst_95 = arith.constant 1.000000e+00 : f32
      %204 = vector.broadcast %cst_95 : f32 to vector<16x1xf32>
      %c0_96 = arith.constant 0 : index
      %c0_97 = arith.constant 0 : index
      %205 = vector.load %arg14[%c0_96, %c0_97] : memref<16x1xf32, #tpu.memory_space<vmem>>, vector<16x1xf32>
      tpu.vector_store %arg14[%c0_96, %c0_97], %204 {strides = array<i32>} : memref<16x1xf32, #tpu.memory_space<vmem>>, vector<16x1xf32>,
      %cst_98 = arith.constant 0.000000e+00 : f32
      %206 = vector.broadcast %cst_98 : f32 to vector<2x64xf32>
      %c0_99 = arith.constant 0 : index
      %c0_100 = arith.constant 0 : index
      %207 = vector.load %arg15[%c0_99, %c0_100] : memref<2x64xf32, #tpu.memory_space<vmem>>, vector<2x64xf32>
      tpu.vector_store %arg15[%c0_99, %c0_100], %206 {strides = array<i32>} : memref<2x64xf32, #tpu.memory_space<vmem>>, vector<2x64xf32>,
    } else {
    }
    %c0 = arith.constant 0 : index
    %c0_1 = arith.constant 0 : index
    %3 = vector.load %arg14[%c0, %c0_1] : memref<16x1xf32, #tpu.memory_space<vmem>>, vector<16x1xf32>
    %c0_2 = arith.constant 0 : index
    %c0_3 = arith.constant 0 : index
    %4 = vector.load %arg13[%c0_2, %c0_3] : memref<16x32xf32, #tpu.memory_space<vmem>>, vector<16x32xf32>
    %5 = vector.broadcast %3 : vector<16x1xf32> to vector<16x32xf32>
    %6 = arith.mulf %4, %5 : vector<16x32xf32>
    %c0_4 = arith.constant 0 : index
    %c0_5 = arith.constant 0 : index
    %7 = vector.load %arg1[%c0_4, %c0_5] : memref<16x16xbf16, #tpu.memory_space<vmem>>, vector<16x16xbf16>
    %8 = arith.extf %7 : vector<16x16xbf16> to vector<16x16xf32>
    %cst = arith.constant dense<0.000000e+00> : vector<16x32xf32>
    %9 = tpu.matmul %8, %6, %cst {dimension_numbers = #tpu.dot_dimension_numbers<[1], [0], [0], [1], [0, 0, 1, 1], [], []>} : vector<16x16xf32>, vector<16x32xf32>, vector<16x32xf32> -> vector<16x32xf32>
    %10 = tpu.concatenate %9, %6 in 1 : vector<16x32xf32>, vector<16x32xf32> -> vector<16x64xf32>
    %c0_6 = arith.constant 0 : index
    %c0_7 = arith.constant 0 : index
    %c0_8 = arith.constant 0 : index
    %11 = vector.load %arg5[%c0_6, %c0_7, %c0_8] : memref<1x64x32xf32, #tpu.memory_space<vmem>>, vector<1x64x32xf32>
    %12 = vector.shape_cast %11 : vector<1x64x32xf32> to vector<64x32xf32>
    %cst_9 = arith.constant dense<0.000000e+00> : vector<16x32xf32>
    %13 = tpu.matmul %10, %12, %cst_9 {dimension_numbers = #tpu.dot_dimension_numbers<[1], [0], [0], [1], [0, 0, 1, 1], [], []>} : vector<16x64xf32>, vector<64x32xf32>, vector<16x32xf32> -> vector<16x32xf32>
    %c0_10 = arith.constant 0 : index
    %c0_11 = arith.constant 0 : index
    %c0_12 = arith.constant 0 : index
    %14 = vector.load %arg6[%c0_10, %c0_11, %c0_12] : memref<1x1x32xf32, #tpu.memory_space<vmem>>, vector<1x1x32xf32>
    %15 = vector.shape_cast %14 : vector<1x1x32xf32> to vector<1x32xf32>
    %16 = vector.broadcast %15 : vector<1x32xf32> to vector<16x32xf32>
    %17 = arith.addf %13, %16 : vector<16x32xf32>
    %cst_13 = arith.constant 5.000000e-01 : f32
    %18 = vector.broadcast %cst_13 : f32 to vector<16x32xf32>
    %19 = arith.mulf %18, %17 : vector<16x32xf32>
    %cst_14 = arith.constant 0.707106769 : f32
    %20 = vector.broadcast %cst_14 : f32 to vector<16x32xf32>
    %21 = arith.mulf %17, %20 : vector<16x32xf32>
    %cst_15 = arith.constant 0.000000e+00 : f32
    %22 = vector.broadcast %cst_15 : f32 to vector<16x32xf32>
    %23 = arith.cmpf oge, %21, %22 : vector<16x32xf32>
    %cst_16 = arith.constant 1.000000e+00 : f32
    %cst_17 = arith.constant -1.000000e+00 : f32
    %24 = vector.broadcast %cst_16 : f32 to vector<16x32xf32>
    %25 = vector.broadcast %cst_17 : f32 to vector<16x32xf32>
    %26 = arith.select %23, %24, %25 : vector<16x32xi1>, vector<16x32xf32>
    %27 = math.absf %21 : vector<16x32xf32>
    %cst_18 = arith.constant 0.327591091 : f32
    %28 = vector.broadcast %cst_18 : f32 to vector<16x32xf32>
    %29 = arith.mulf %28, %27 : vector<16x32xf32>
    %cst_19 = arith.constant 1.000000e+00 : f32
    %30 = vector.broadcast %cst_19 : f32 to vector<16x32xf32>
    %31 = arith.addf %30, %29 : vector<16x32xf32>
    %cst_20 = arith.constant 1.000000e+00 : f32
    %32 = vector.broadcast %cst_20 : f32 to vector<16x32xf32>
    %33 = arith.divf %32, %31 : vector<16x32xf32>
    %cst_21 = arith.constant 1.06140542 : f32
    %34 = vector.broadcast %cst_21 : f32 to vector<16x32xf32>
    %35 = arith.mulf %34, %33 : vector<16x32xf32>
    %cst_22 = arith.constant -1.45315206 : f32
    %36 = vector.broadcast %cst_22 : f32 to vector<16x32xf32>
    %37 = arith.addf %35, %36 : vector<16x32xf32>
    %38 = arith.mulf %37, %33 : vector<16x32xf32>
    %cst_23 = arith.constant 1.42141378 : f32
    %39 = vector.broadcast %cst_23 : f32 to vector<16x32xf32>
    %40 = arith.addf %38, %39 : vector<16x32xf32>
    %41 = arith.mulf %40, %33 : vector<16x32xf32>
    %cst_24 = arith.constant -0.284496725 : f32
    %42 = vector.broadcast %cst_24 : f32 to vector<16x32xf32>
    %43 = arith.addf %41, %42 : vector<16x32xf32>
    %44 = arith.mulf %43, %33 : vector<16x32xf32>
    %cst_25 = arith.constant 0.254829586 : f32
    %45 = vector.broadcast %cst_25 : f32 to vector<16x32xf32>
    %46 = arith.addf %44, %45 : vector<16x32xf32>
    %47 = arith.mulf %46, %33 : vector<16x32xf32>
    %cst_26 = arith.constant 0.000000e+00 : f32
    %48 = vector.broadcast %cst_26 : f32 to vector<16x32xf32>
    %49 = arith.subf %48, %27 : vector<16x32xf32>
    %50 = arith.mulf %49, %27 : vector<16x32xf32>
    %51 = math.exp %50 : vector<16x32xf32>
    %52 = arith.mulf %47, %51 : vector<16x32xf32>
    %cst_27 = arith.constant 1.000000e+00 : f32
    %53 = vector.broadcast %cst_27 : f32 to vector<16x32xf32>
    %54 = arith.subf %53, %52 : vector<16x32xf32>
    %55 = arith.mulf %26, %54 : vector<16x32xf32>
    %cst_28 = arith.constant 1.000000e+00 : f32
    %56 = vector.broadcast %cst_28 : f32 to vector<16x32xf32>
    %57 = arith.addf %56, %55 : vector<16x32xf32>
    %58 = arith.mulf %19, %57 : vector<16x32xf32>
    %59 = vector.shape_cast %3 : vector<16x1xf32> to vector<1x16x1xf32>
    %cst_29 = arith.constant dense<0.000000e+00> : vector<1xf32>
    %60 = vector.multi_reduction <add>, %59, %cst_29 [1, 2] : vector<1x16x1xf32> to vector<1xf32>
    %61 = vector.shape_cast %60 : vector<1xf32> to vector<1x1x1xf32>
    %62 = vector.extract %61[0, 0, 0] : f32 from vector<1x1x1xf32>
    %cst_30 = arith.constant 1.000000e+00 : f32
    %63 = arith.maximumf %62, %cst_30 : f32
    %64 = vector.broadcast %3 : vector<16x1xf32> to vector<16x32xf32>
    %65 = arith.mulf %58, %64 : vector<16x32xf32>
    %cst_31 = arith.constant dense<0.000000e+00> : vector<32xf32>
    %66 = vector.multi_reduction <add>, %65, %cst_31 [0] : vector<16x32xf32> to vector<32xf32>
    %67 = vector.shape_cast %66 : vector<32xf32> to vector<1x32xf32>
    %68 = vector.broadcast %63 : f32 to vector<1x32xf32>
    %69 = arith.divf %67, %68 : vector<1x32xf32>
    %70 = vector.broadcast %69 : vector<1x32xf32> to vector<16x32xf32>
    %71 = arith.subf %58, %70 : vector<16x32xf32>
    %72 = vector.broadcast %3 : vector<16x1xf32> to vector<16x32xf32>
    %73 = arith.mulf %71, %72 : vector<16x32xf32>
    %74 = arith.mulf %73, %73 : vector<16x32xf32>
    %cst_32 = arith.constant dense<0.000000e+00> : vector<32xf32>
    %75 = vector.multi_reduction <add>, %74, %cst_32 [0] : vector<16x32xf32> to vector<32xf32>
    %76 = vector.shape_cast %75 : vector<32xf32> to vector<1x32xf32>
    %77 = vector.broadcast %63 : f32 to vector<1x32xf32>
    %78 = arith.divf %76, %77 : vector<1x32xf32>
    %c0_33 = arith.constant 0 : index
    %c0_34 = arith.constant 0 : index
    %c0_35 = arith.constant 0 : index
    %79 = vector.load %arg7[%c0_33, %c0_34, %c0_35] : memref<1x1x32xf32, #tpu.memory_space<vmem>>, vector<1x1x32xf32>
    %80 = vector.shape_cast %79 : vector<1x1x32xf32> to vector<1x32xf32>
    %81 = vector.broadcast %69 : vector<1x32xf32> to vector<16x32xf32>
    %82 = arith.subf %58, %81 : vector<16x32xf32>
    %83 = vector.broadcast %80 : vector<1x32xf32> to vector<16x32xf32>
    %84 = arith.mulf %83, %82 : vector<16x32xf32>
    %cst_36 = arith.constant 9.99999974E-6 : f32
    %85 = vector.broadcast %cst_36 : f32 to vector<1x32xf32>
    %86 = arith.addf %78, %85 : vector<1x32xf32>
    %87 = math.rsqrt %86 : vector<1x32xf32>
    %88 = vector.broadcast %87 : vector<1x32xf32> to vector<16x32xf32>
    %89 = arith.mulf %84, %88 : vector<16x32xf32>
    %c0_37 = arith.constant 0 : index
    %c0_38 = arith.constant 0 : index
    %c0_39 = arith.constant 0 : index
    %90 = vector.load %arg8[%c0_37, %c0_38, %c0_39] : memref<1x1x32xf32, #tpu.memory_space<vmem>>, vector<1x1x32xf32>
    %91 = vector.shape_cast %90 : vector<1x1x32xf32> to vector<1x32xf32>
    %92 = vector.broadcast %91 : vector<1x32xf32> to vector<16x32xf32>
    %93 = arith.addf %89, %92 : vector<16x32xf32>
    %c0_40 = arith.constant 0 : index
    %c0_41 = arith.constant 0 : index
    %c0_42 = arith.constant 0 : index
    %94 = vector.load %arg9[%c0_40, %c0_41, %c0_42] : memref<1x1x32xf32, #tpu.memory_space<vmem>>, vector<1x1x32xf32>
    %95 = vector.shape_cast %94 : vector<1x1x32xf32> to vector<1x32xf32>
    %96 = arith.mulf %95, %95 : vector<1x32xf32>
    %97 = vector.shape_cast %96 : vector<1x32xf32> to vector<1x1x32xf32>
    %cst_43 = arith.constant dense<0.000000e+00> : vector<1xf32>
    %98 = vector.multi_reduction <add>, %97, %cst_43 [1, 2] : vector<1x1x32xf32> to vector<1xf32>
    %99 = vector.shape_cast %98 : vector<1xf32> to vector<1x1x1xf32>
    %100 = vector.extract %99[0, 0, 0] : f32 from vector<1x1x1xf32>
    %101 = math.sqrt %100 : f32
    %102 = vector.broadcast %95 : vector<1x32xf32> to vector<16x32xf32>
    %103 = arith.mulf %93, %102 : vector<16x32xf32>
    %cst_44 = arith.constant dense<0.000000e+00> : vector<16xf32>
    %104 = vector.multi_reduction <add>, %103, %cst_44 [1] : vector<16x32xf32> to vector<16xf32>
    %105 = vector.shape_cast %104 : vector<16xf32> to vector<16x1xf32>
    %106 = vector.broadcast %101 : f32 to vector<16x1xf32>
    %107 = arith.divf %105, %106 : vector<16x1xf32>
    %108 = math.tanh %107 : vector<16x1xf32>
    %cst_45 = arith.constant 5.000000e-01 : f32
    %109 = vector.broadcast %cst_45 : f32 to vector<16x1xf32>
    %110 = arith.cmpf ogt, %3, %109 : vector<16x1xf32>
    %cst_46 = arith.constant -3.000000e+00 : f32
    %111 = vector.broadcast %cst_46 : f32 to vector<16x1xf32>
    %112 = arith.select %110, %108, %111 : vector<16x1xi1>, vector<16x1xf32>
    %113 = tpu.transpose %112, [1, 0] : vector<16x1xf32> -> vector<1x16xf32>
    %114 = tpu.iota {dimensions = array<i32: 0>} : vector<16x16xi32>
    %115 = tpu.iota {dimensions = array<i32: 1>} : vector<16x16xi32>
    %116 = arith.cmpi ne, %115, %114 : vector<16x16xi32>
    %117 = vector.broadcast %113 : vector<1x16xf32> to vector<16x16xf32>
    %118 = vector.broadcast %112 : vector<16x1xf32> to vector<16x16xf32>
    %119 = arith.cmpf ogt, %117, %118 : vector<16x16xf32>
    %120 = vector.broadcast %113 : vector<1x16xf32> to vector<16x16xf32>
    %121 = vector.broadcast %112 : vector<16x1xf32> to vector<16x16xf32>
    %122 = arith.cmpf oeq, %120, %121 : vector<16x16xf32>
    %123 = arith.cmpi slt, %115, %114 : vector<16x16xi32>
    %124 = arith.andi %122, %123 : vector<16x16xi1>
    %125 = arith.ori %119, %124 : vector<16x16xi1>
    %126 = arith.andi %116, %125 : vector<16x16xi1>
    %c0_47 = arith.constant 0 : index
    %c0_48 = arith.constant 0 : index
    %127 = vector.load %arg2[%c0_47, %c0_48] : memref<16x16xf32, #tpu.memory_space<vmem>>, vector<16x16xf32>
    %cst_49 = arith.constant 0.000000e+00 : f32
    %128 = vector.broadcast %cst_49 : f32 to vector<16x16xf32>
    %129 = arith.select %126, %127, %128 : vector<16x16xi1>, vector<16x16xf32>
    %cst_50 = arith.constant 1.000000e+00 : f32
    %130 = vector.broadcast %cst_50 : f32 to vector<16x1xf32>
    %cst_51 = arith.constant dense<0.000000e+00> : vector<16x1xf32>
    %131 = tpu.matmul %129, %130, %cst_51 {dimension_numbers = #tpu.dot_dimension_numbers<[1], [0], [0], [1], [0, 0, 1, 1], [], []>} : vector<16x16xf32>, vector<16x1xf32>, vector<16x1xf32> -> vector<16x1xf32>
    %c0_52 = arith.constant 0 : index
    %c0_53 = arith.constant 0 : index
    %132 = vector.load %arg2[%c0_52, %c0_53] : memref<16x16xf32, #tpu.memory_space<vmem>>, vector<16x16xf32>
    %cst_54 = arith.constant dense<0.000000e+00> : vector<16x1xf32>
    %133 = tpu.matmul %132, %3, %cst_54 {dimension_numbers = #tpu.dot_dimension_numbers<[1], [0], [0], [1], [0, 0, 1, 1], [], []>} : vector<16x16xf32>, vector<16x1xf32>, vector<16x1xf32> -> vector<16x1xf32>
    %cst_55 = arith.constant 5.000000e-01 : f32
    %134 = vector.broadcast %cst_55 : f32 to vector<16x1xf32>
    %135 = arith.mulf %134, %133 : vector<16x1xf32>
    %136 = math.ceil %135 : vector<16x1xf32>
    %137 = arith.cmpf olt, %131, %136 : vector<16x1xf32>
    %138 = arith.extui %137 : vector<16x1xi1> to vector<16x1xi32>
    %139 = arith.sitofp %138 : vector<16x1xi32> to vector<16x1xf32>
    %140 = arith.mulf %3, %139 : vector<16x1xf32>
    %141 = vector.broadcast %108 : vector<16x1xf32> to vector<16x32xf32>
    %142 = arith.mulf %93, %141 : vector<16x32xf32>
    %c0_56 = arith.constant 0 : index
    %c0_57 = arith.constant 0 : index
    %143 = vector.load %arg13[%c0_56, %c0_57] : memref<16x32xf32, #tpu.memory_space<vmem>>, vector<16x32xf32>
    tpu.vector_store %arg13[%c0_56, %c0_57], %142 {strides = array<i32>} : memref<16x32xf32, #tpu.memory_space<vmem>>, vector<16x32xf32>,
    %c0_58 = arith.constant 0 : index
    %c0_59 = arith.constant 0 : index
    %144 = vector.load %arg14[%c0_58, %c0_59] : memref<16x1xf32, #tpu.memory_space<vmem>>, vector<16x1xf32>
    tpu.vector_store %arg14[%c0_58, %c0_59], %140 {strides = array<i32>} : memref<16x1xf32, #tpu.memory_space<vmem>>, vector<16x1xf32>,
    %c0_60 = arith.constant 0 : index
    %c0_61 = arith.constant 0 : index
    %145 = vector.load %arg4[%c0_60, %c0_61] : memref<16x2xf32, #tpu.memory_space<vmem>>, vector<16x1xf32>
    %146 = arith.mulf %145, %140 : vector<16x1xf32>
    %cst_62 = arith.constant 5.000000e-01 : f32
    %147 = vector.broadcast %cst_62 : f32 to vector<16x1xf32>
    %148 = arith.cmpf ogt, %146, %147 : vector<16x1xf32>
    %cst_63 = arith.constant -1.000000e+30 : f32
    %149 = vector.shape_cast %148 : vector<16x1xi1> to vector<16x1xi1>
    %150 = vector.broadcast %149 : vector<16x1xi1> to vector<16x32xi1>
    %151 = vector.broadcast %cst_63 : f32 to vector<16x32xf32>
    %152 = arith.select %150, %142, %151 : vector<16x32xi1>, vector<16x32xf32>
    %cst_64 = arith.constant dense<0xFF800000> : vector<32xf32>
    %153 = vector.multi_reduction <maximumf>, %152, %cst_64 [0] : vector<16x32xf32> to vector<32xf32>
    %154 = vector.shape_cast %153 : vector<32xf32> to vector<1x32xf32>
    %155 = vector.shape_cast %146 : vector<16x1xf32> to vector<1x16x1xf32>
    %cst_65 = arith.constant dense<0.000000e+00> : vector<1xf32>
    %156 = vector.multi_reduction <add>, %155, %cst_65 [1, 2] : vector<1x16x1xf32> to vector<1xf32>
    %157 = vector.shape_cast %156 : vector<1xf32> to vector<1x1x1xf32>
    %158 = vector.extract %157[0, 0, 0] : f32 from vector<1x1x1xf32>
    %cst_66 = arith.constant 1.000000e+00 : f32
    %159 = arith.maximumf %158, %cst_66 : f32
    %160 = vector.broadcast %146 : vector<16x1xf32> to vector<16x32xf32>
    %161 = arith.mulf %142, %160 : vector<16x32xf32>
    %cst_67 = arith.constant dense<0.000000e+00> : vector<32xf32>
    %162 = vector.multi_reduction <add>, %161, %cst_67 [0] : vector<16x32xf32> to vector<32xf32>
    %163 = vector.shape_cast %162 : vector<32xf32> to vector<1x32xf32>
    %164 = vector.broadcast %159 : f32 to vector<1x32xf32>
    %165 = arith.divf %163, %164 : vector<1x32xf32>
    %c0_68 = arith.constant 0 : index
    %c0_69 = arith.constant 0 : index
    %166 = vector.load %arg15[%c0_68, %c0_69] : memref<2x64xf32, #tpu.memory_space<vmem>>, vector<1x32xf32>
    %167 = arith.addf %166, %154 : vector<1x32xf32>
    %c0_70 = arith.constant 0 : index
    %c0_71 = arith.constant 0 : index
    %168 = vector.load %arg15[%c0_70, %c0_71] : memref<2x64xf32, #tpu.memory_space<vmem>>, vector<1x32xf32>
    tpu.vector_store %arg15[%c0_70, %c0_71], %167 {strides = array<i32>} : memref<2x64xf32, #tpu.memory_space<vmem>>, vector<1x32xf32>,
    %c0_72 = arith.constant 0 : index
    %c32 = arith.constant 32 : index
    %169 = vector.load %arg15[%c0_72, %c32] : memref<2x64xf32, #tpu.memory_space<vmem>>, vector<1x32xf32>
    %170 = arith.addf %169, %165 : vector<1x32xf32>
    %c0_73 = arith.constant 0 : index
    %c32_74 = arith.constant 32 : index
    %171 = vector.load %arg15[%c0_73, %c32_74] : memref<2x64xf32, #tpu.memory_space<vmem>>, vector<1x32xf32>
    tpu.vector_store %arg15[%c0_73, %c32_74], %170 {strides = array<i32>} : memref<2x64xf32, #tpu.memory_space<vmem>>, vector<1x32xf32>,
    %c0_75 = arith.constant 0 : index
    %c1 = arith.constant 1 : index
    %172 = vector.load %arg4[%c0_75, %c1] : memref<16x2xf32, #tpu.memory_space<vmem>>, vector<16x1xf32>
    %173 = arith.mulf %172, %140 : vector<16x1xf32>
    %cst_76 = arith.constant 5.000000e-01 : f32
    %174 = vector.broadcast %cst_76 : f32 to vector<16x1xf32>
    %175 = arith.cmpf ogt, %173, %174 : vector<16x1xf32>
    %cst_77 = arith.constant -1.000000e+30 : f32
    %176 = vector.shape_cast %175 : vector<16x1xi1> to vector<16x1xi1>
    %177 = vector.broadcast %176 : vector<16x1xi1> to vector<16x32xi1>
    %178 = vector.broadcast %cst_77 : f32 to vector<16x32xf32>
    %179 = arith.select %177, %142, %178 : vector<16x32xi1>, vector<16x32xf32>
    %cst_78 = arith.constant dense<0xFF800000> : vector<32xf32>
    %180 = vector.multi_reduction <maximumf>, %179, %cst_78 [0] : vector<16x32xf32> to vector<32xf32>
    %181 = vector.shape_cast %180 : vector<32xf32> to vector<1x32xf32>
    %182 = vector.shape_cast %173 : vector<16x1xf32> to vector<1x16x1xf32>
    %cst_79 = arith.constant dense<0.000000e+00> : vector<1xf32>
    %183 = vector.multi_reduction <add>, %182, %cst_79 [1, 2] : vector<1x16x1xf32> to vector<1xf32>
    %184 = vector.shape_cast %183 : vector<1xf32> to vector<1x1x1xf32>
    %185 = vector.extract %184[0, 0, 0] : f32 from vector<1x1x1xf32>
    %cst_80 = arith.constant 1.000000e+00 : f32
    %186 = arith.maximumf %185, %cst_80 : f32
    %187 = vector.broadcast %173 : vector<16x1xf32> to vector<16x32xf32>
    %188 = arith.mulf %142, %187 : vector<16x32xf32>
    %cst_81 = arith.constant dense<0.000000e+00> : vector<32xf32>
    %189 = vector.multi_reduction <add>, %188, %cst_81 [0] : vector<16x32xf32> to vector<32xf32>
    %190 = vector.shape_cast %189 : vector<32xf32> to vector<1x32xf32>
    %191 = vector.broadcast %186 : f32 to vector<1x32xf32>
    %192 = arith.divf %190, %191 : vector<1x32xf32>
    %c1_82 = arith.constant 1 : index
    %c0_83 = arith.constant 0 : index
    %193 = vector.load %arg15[%c1_82, %c0_83] : memref<2x64xf32, #tpu.memory_space<vmem>>, vector<1x32xf32>
    %194 = arith.addf %193, %181 : vector<1x32xf32>
    %c1_84 = arith.constant 1 : index
    %c0_85 = arith.constant 0 : index
    %195 = vector.load %arg15[%c1_84, %c0_85] : memref<2x64xf32, #tpu.memory_space<vmem>>, vector<1x32xf32>
    tpu.vector_store %arg15[%c1_84, %c0_85], %194 {strides = array<i32>} : memref<2x64xf32, #tpu.memory_space<vmem>>, vector<1x32xf32>,
    %c1_86 = arith.constant 1 : index
    %c32_87 = arith.constant 32 : index
    %196 = vector.load %arg15[%c1_86, %c32_87] : memref<2x64xf32, #tpu.memory_space<vmem>>, vector<1x32xf32>
    %197 = arith.addf %196, %192 : vector<1x32xf32>
    %c1_88 = arith.constant 1 : index
    %c32_89 = arith.constant 32 : index
    %198 = vector.load %arg15[%c1_88, %c32_89] : memref<2x64xf32, #tpu.memory_space<vmem>>, vector<1x32xf32>
    tpu.vector_store %arg15[%c1_88, %c32_89], %197 {strides = array<i32>} : memref<2x64xf32, #tpu.memory_space<vmem>>, vector<1x32xf32>,
    %c3_i32 = arith.constant 3 : i32
    %199 = arith.cmpi eq, %arg0, %c3_i32 : i32
    %200 = arith.extui %199 : i1 to i32
    %c0_i32_90 = arith.constant 0 : i32
    %201 = arith.cmpi ne, %200, %c0_i32_90 : i32
    scf.if %201 {
      %c0_91 = arith.constant 0 : index
      %c0_92 = arith.constant 0 : index
      %202 = vector.load %arg15[%c0_91, %c0_92] : memref<2x64xf32, #tpu.memory_space<vmem>>, vector<2x64xf32>
      %c0_93 = arith.constant 0 : index
      %c0_94 = arith.constant 0 : index
      %203 = vector.load %arg10[%c0_93, %c0_94] : memref<64x32xf32, #tpu.memory_space<vmem>>, vector<64x32xf32>
      %cst_95 = arith.constant dense<0.000000e+00> : vector<2x32xf32>
      %204 = tpu.matmul %202, %203, %cst_95 {dimension_numbers = #tpu.dot_dimension_numbers<[1], [0], [0], [1], [0, 0, 1, 1], [], []>} : vector<2x64xf32>, vector<64x32xf32>, vector<2x32xf32> -> vector<2x32xf32>
      %c0_96 = arith.constant 0 : index
      %c0_97 = arith.constant 0 : index
      %205 = vector.load %arg11[%c0_96, %c0_97] : memref<1x32xf32, #tpu.memory_space<vmem>>, vector<1x32xf32>
      %206 = vector.broadcast %205 : vector<1x32xf32> to vector<2x32xf32>
      %207 = arith.addf %204, %206 : vector<2x32xf32>
      %c0_98 = arith.constant 0 : index
      %c0_99 = arith.constant 0 : index
      %208 = vector.load %arg12[%c0_98, %c0_99] : memref<2x32xf32, #tpu.memory_space<vmem>>, vector<2x32xf32>
      tpu.vector_store %arg12[%c0_98, %c0_99], %207 {strides = array<i32>} : memref<2x32xf32, #tpu.memory_space<vmem>>, vector<2x32xf32>,
    } else {
    }
    return
  }
  func.func @transform_0(%arg0: i32) -> (i32, i32) {
    %c0_i32 = arith.constant 0 : i32
    %c0_i32_0 = arith.constant 0 : i32
    %c0_i32_1 = arith.constant 0 : i32
    return %c0_i32, %c0_i32_0 : i32, i32
  }
  func.func @transform_1(%arg0: i32) -> (i32, i32) {
    %c0_i32 = arith.constant 0 : i32
    %c0_i32_0 = arith.constant 0 : i32
    %c0_i32_1 = arith.constant 0 : i32
    return %c0_i32, %c0_i32_0 : i32, i32
  }
  func.func @transform_2(%arg0: i32) -> (i32, i32) {
    %c0_i32 = arith.constant 0 : i32
    %c0_i32_0 = arith.constant 0 : i32
    %c0_i32_1 = arith.constant 0 : i32
    return %c0_i32, %c0_i32_0 : i32, i32
  }
  func.func @transform_3(%arg0: i32) -> (i32, i32) {
    %c0_i32 = arith.constant 0 : i32
    %c0_i32_0 = arith.constant 0 : i32
    %c0_i32_1 = arith.constant 0 : i32
    return %c0_i32, %c0_i32_0 : i32, i32
  }
  func.func @transform_4(%arg0: i32) -> (i32, i32, i32) {
    %c0_i32 = arith.constant 0 : i32
    %c0_i32_0 = arith.constant 0 : i32
    %c0_i32_1 = arith.constant 0 : i32
    return %arg0, %c0_i32, %c0_i32_0 : i32, i32, i32
  }
  func.func @transform_5(%arg0: i32) -> (i32, i32, i32) {
    %c0_i32 = arith.constant 0 : i32
    %c0_i32_0 = arith.constant 0 : i32
    %c0_i32_1 = arith.constant 0 : i32
    return %arg0, %c0_i32, %c0_i32_0 : i32, i32, i32
  }
  func.func @transform_6(%arg0: i32) -> (i32, i32, i32) {
    %c0_i32 = arith.constant 0 : i32
    %c0_i32_0 = arith.constant 0 : i32
    %c0_i32_1 = arith.constant 0 : i32
    return %arg0, %c0_i32, %c0_i32_0 : i32, i32, i32
  }
  func.func @transform_7(%arg0: i32) -> (i32, i32, i32) {
    %c0_i32 = arith.constant 0 : i32
    %c0_i32_0 = arith.constant 0 : i32
    %c0_i32_1 = arith.constant 0 : i32
    return %arg0, %c0_i32, %c0_i32_0 : i32, i32, i32
  }
  func.func @transform_8(%arg0: i32) -> (i32, i32, i32) {
    %c0_i32 = arith.constant 0 : i32
    %c0_i32_0 = arith.constant 0 : i32
    %c0_i32_1 = arith.constant 0 : i32
    return %arg0, %c0_i32, %c0_i32_0 : i32, i32, i32
  }
  func.func @transform_9(%arg0: i32) -> (i32, i32) {
    %c0_i32 = arith.constant 0 : i32
    %c0_i32_0 = arith.constant 0 : i32
    %c0_i32_1 = arith.constant 0 : i32
    return %c0_i32, %c0_i32_0 : i32, i32
  }
  func.func @transform_10(%arg0: i32) -> (i32, i32) {
    %c0_i32 = arith.constant 0 : i32
    %c0_i32_0 = arith.constant 0 : i32
    %c0_i32_1 = arith.constant 0 : i32
    return %c0_i32, %c0_i32_0 : i32, i32
  }
  func.func @transform_11(%arg0: i32) -> (i32, i32) {
    %c0_i32 = arith.constant 0 : i32
    %c0_i32_0 = arith.constant 0 : i32
    %c0_i32_1 = arith.constant 0 : i32
    return %c0_i32, %c0_i32_0 : i32, i32
  }
}

</mosaic_0001>

<bundles_post_ra>
// kernel: gcn_topk4_forward.1
= control target key start
LH: loop header
LB: loop body
LE: loop exit
PB: predicated region body
PF: predicated region fallthrough
CT: control target
= control target key end

     0   :  { %16 = vsyncpa [#allocation6], 0  ;;  %s1750_s17 = smov 0   ;;  %s2005_s0 = inlined_call_operand.vmem [shape: bf16[16,16], index: 0, kind: input, shape index: {}]   ;;  %s2006_s1 = inlined_call_operand.vmem [shape: f32[16,16], index: 1, kind: input, shape index: {}]   ;;  %s2007_s2 = inlined_call_operand.vmem [shape: f32[16,32], index: 2, kind: input, shape index: {}]   ;;  %s2008_s3 = inlined_call_operand.vmem [shape: f32[16,2], index: 3, kind: input, shape index: {}]   ;;  %s2009_s4 = inlined_call_operand.vmem [shape: f32[4,64,32], index: 4, kind: input, shape index: {}]   ;;  %s2010_s5 = inlined_call_operand.vmem [shape: f32[4,1,32], index: 5, kind: input, shape index: {}]   ;;  %s2011_s6 = inlined_call_operand.vmem [shape: f32[4,1,32], index: 6, kind: input, shape index: {}]   ;;  %s2012_s7 = inlined_call_operand.vmem [shape: f32[4,1,32], index: 7, kind: input, shape index: {}]   ;;  %s2013_s8 = inlined_call_operand.vmem [shape: f32[4,1,32], index: 8, kind: input, shape index: {}]   ;;  %s2014_s9 = inlined_call_operand.vmem [shape: f32[64,32], index: 9, kind: input, shape index: {}]   ;;  %s2015_s10 = inlined_call_operand.vmem [shape: f32[1,32], index: 10, kind: input, shape index: {}]   ;;  %s2016_s11 = inlined_call_operand.hbm [shape: f32[2,32], index: 11, kind: output, shape index: {}]  }
   0x1 LB: > { %s1756_s18 = sadd.s32 4294967295, %s1673_s17   ;;  %p1411_p0 = scmp.ge.s32.totalorder %s1673_s17, 1  ;;  %s1673_s17 = sphi %s1750_s17, %s22_s17  }
   0x2   : > { %p365_p1 = scmp.lt.s32.totalorder %s1673_s17, 5 }
   0x4   : > { %p366_p2 = pnand %p1411_p0, %p365_p1 }
   0x5   : > { %p412_p3 = scmp.lt.s32.totalorder (!%p366_p2), %s1756_s18, 3  ;;  %p1414_p4 = scmp.ne.s32.totalorder (!%p366_p2), %s1756_s18, 0 }
   0x6   : > { %369 = sbr.rel (%p366_p2) target bundleno = 2087 (0x827), region = 64 }
   0xd   : > { %s1762_s19 = scalar_select %p412_p3, %s1756_s18, 3 }
   0xe   : > { %432 = sbr.rel (%p1414_p4) target bundleno = 21 (0x15), region = 68  ;;  %v433_v0 = vld [vmem:[%s2007_s2] sm:$0xff] (!%p1414_p4)  ;;  %vm435_vm0 = vcmask (!%p1414_p4), 261120   ;;  %v434_v1 = vld [vmem:[%s2007_s2 + $0x8] sm:$0xff] (!%p1414_p4)  ;;  %vm438_vm1 = vcmask (!%p1414_p4), 7168   ;;  %vm441_vm2 = vcmask (!%p1414_p4), 517120  }
   0xf   : > { %s1435_s20 = sshll.u32 %s1762_s19, 6  ;;  %s419_s23 = scalar_lea.vmem %s2010_s5, %s1762_s19  ;;  %436 = vst.msk [vmem:[#allocation2] sm:$0xff] (!%p1414_p4), %vm435_vm0, %v433_v0  ;;  %437 = vst.msk [vmem:[#allocation2 + $0x8] sm:$0xff] (!%p1414_p4), %vm435_vm0, %v434_v1  ;;  %v1675_v2 = vmov (!%p1414_p4), 1.0   ;;  %v1676_v3 = vmov (!%p1414_p4), 0.0  }
  0x10   : > { %s1772_s26 = scalar_lea.vmem %s2009_s4, %s1435_s20  ;;  %s422_s29 = scalar_lea.vmem %s2011_s6, %s1762_s19  ;;  %439 = vst.msk [vmem:[#allocation3] sm:$0xff] (!%p1414_p4), %vm438_vm1, %v1675_v2  ;;  %440 = vst.msk [vmem:[#allocation3 + $0x8] sm:$0xff] (!%p1414_p4), %vm438_vm1, %v1675_v2 }
  0x11   : > { %s425_s13 = scalar_lea.vmem %s2012_s7, %s1762_s19  ;;  %s428_s16 = scalar_lea.vmem %s2013_s8, %s1762_s19  ;;  %442 = vst.msk [vmem:[#allocation4] sm:$0x3] (!%p1414_p4), %vm441_vm2, %v1676_v3 }
  0x15 PF: > { %v1677_v5 = vmov 0   ;;  %v1437_v7 = vld [vmem:[%s2005_s0] sm:$0xff]   ;;  %vm463_vm3 = vcmask 130048   ;;  %v557_v10 = vld [vmem:[%s1772_s26 + $0x8] sm:$0xff]  ;;  %v558_v11 = vld [vmem:[%s1772_s26 + $0x10] sm:$0xff]  ;;  %s1678_s28 = smov 32  }
  0x16   : > { %1607 = vset.pattern.permute.xlu0 %v1677_v5  ;;  %1608 = vset.pattern.permute.xlu1 %v1677_v5  ;;  %v1438_v8 = vunpack.c.l.bf16 %v1437_v7  ;;  %v556_v9 = vld [vmem:[%s1772_s26] sm:$0xff]  ;;  %v559_v13 = vld [vmem:[%s1772_s26 + $0x18] sm:$0xff]  ;;  %v561_v16 = vld [vmem:[%s1772_s26 + $0x28] sm:$0xff]  ;;  %v1439_v25 = vunpack.c.h.bf16 %v1437_v7  ;;  %vm707_vm4 = vcmask 7168   ;;  %vm2018_vm5 = vcmask 253952   ;;  %p1428_p5 = scmp.ne.s32.totalorder %s1756_s18, 3 }
  0x17   : > { %v1793_v4 = vld [vmem:[#allocation3] sm:$0xff]  ;;  %v1798_v6 = vld [vmem:[#allocation3 + $0x8] sm:$0xff]  ;;  %v1534_v12 = vpack.c.bf16 %v557_v10, %v556_v9  ;;  %v1538_v14 = vpack.c.bf16 %v559_v13, %v558_v11  ;;  %v560_v15 = vld [vmem:[%s1772_s26 + $0x20] sm:$0xff]  ;;  %vm2019_vm6 = vcmask 261120   ;;  %vm2017_vm7 = vcmask 523264  }
  0x18   : > { %449 = vperm.xlu0 %1607, %v1793_v4   ;;  %1475 = vmatprep.mubr.msk.f32.mxu0 %vm463_vm3, %v1438_v8  ;;  %v445_v17 = vld [vmem:[#allocation2] sm:$0xff]  ;;  %v1542_v18 = vpack.c.bf16 %v561_v16, %v560_v15  ;;  %v446_v21 = vld [vmem:[#allocation2 + $0x8] sm:$0xff]  ;;  %v562_v26 = vld [vmem:[%s1772_s26 + $0x30] sm:$0xff]  ;;  %v708_v30 = vsel %vm707_vm4, %v1793_v4, 0.0  ;;  %v709_v31 = vsel %vm707_vm4, %v1798_v6, 0.0  ;;  %vm815_vm12 = vcmp.gt.f32.partialorder %v1793_v4, 0.5 }
  0x19   : > { %1535 = vmatprep.subr.bf16.mxu1 %v1534_v12  ;;  %v563_v27 = vld [vmem:[%s1772_s26 + $0x38] sm:$0xff]  ;;  %v1827_v29 = vld [vmem:[%s428_s16] sm:$0x1]  ;;  %v710_v33 = vadd.f32 %v709_v31, %v708_v30  ;;  %vm816_vm13 = vcmp.gt.f32.partialorder %v1798_v6, 0.5 }
  0x1a   : > { %1537 = vmatpush3.bf16.msra.mxu1 %v1534_v12  ;;  %v1546_v28 = vpack.c.bf16 %v563_v27, %v562_v26  ;;  %v774_v32 = vmul.f32 %v1827_v29, %v1827_v29  ;;  %v1417_v55 = vld [vmem:[%s419_s23] ss:$0 sm:$0xff]  ;;  %s1680_s23 = smov 1.0  }
  0x1b   : > { %1539 = vmatprep.subr.bf16.mxu1 %v1538_v14 }
  0x1c   : > { %454 = vperm.xlu0 %1607, %v1798_v6   ;;  %v776_v34 = vsel %vm2018_vm5, %v774_v32, 0.0 }
  0x1e   : > { %1541 = vmatpush3.bf16.msra.mxu1 %v1538_v14 }
  0x1f   : > { %1543 = vmatprep.subr.bf16.mxu1 %v1542_v18 }
  0x22   : > { %1545 = vmatpush3.bf16.msra.mxu1 %v1542_v18 }
  0x23   : > { %1547 = vmatprep.subr.bf16.mxu1 %v1546_v28 }
  0x26   : > { %1549 = vmatpush3.bf16.msra.mxu1 %v1546_v28 }
  0x3b   : > { %711 = vadd.xlane.f32.xlu0 %v710_v33 }
  0x97   : > { %v1811_v19 = vpop.permute.xlu0 %449 }
  0x98   : > { %v457_v20 = vmul.f32 %v1811_v19, %v445_v17 }
  0x9a   : > { %547 = vrot.lane.b32.xlu1 %v457_v20, %s1678_s28 }
  0x9b   : > { %v1815_v22 = vpop.permute.xlu0 %454 }
  0x9c   : > { %v458_v23 = vmul.f32 %v1815_v22, %v446_v21 }
  0x9e   : > { %549 = vrot.lane.b32.xlu1 %v458_v23, %s1678_s28  ;;  %v1530_v24 = vpack.c.bf16 %v458_v23, %v457_v20 }
  0xa0   : > { %1531 = vmatprep.subr.bf16.mxu0 %v1530_v24 }
  0xa1   : > { %1533 = vmatpush3.bf16.msra.mxu0 %v1530_v24 }
  0xa4   : > { %1476 = vmatmul.mubr.msk.f32.vlgmr.msra.gmra.mrb[0].mxu0 %vm463_vm3, %v1439_v25 }
  0xc2   : > { %777 = vadd.xlane.f32.xlu1 %v776_v34 }
  0xc8   : > { %v712_v41 = vpop.xlane.xlu0 %711 }
  0xc9   : > { %v713_v42 = vrot.slane %v712_v41, 4 }
  0xcb   : > { %v714_v43 = vadd.f32 %v713_v42, %v712_v41 }
  0xcd   : > { %v715_v44 = vrot.slane %v714_v43, 2 }
  0xcf   : > { %v716_v45 = vadd.f32 %v715_v44, %v714_v43 }
  0xd1   : > { %v717_v46 = vrot.slane %v716_v45, 1 }
  0xd3   : > { %v718_v47 = vadd.f32 %v717_v46, %v716_v45 }
  0xd5   : > { %1568 = vpush %v718_v47  ;;  %v1679_v47 = vmov -1.0  }
 0x106   : > { %s1851_s15 = spop %1568 }
 0x107   : > { %s720_s21 = smax.f32 %s1680_s23, %s1851_s15 }
 0x10c   : > { %v548_v35 = vpop.permute.xlu1 %547 }
 0x110   : > { %v550_v38 = vpop.permute.xlu1 %549 }
 0x14f   : > { %v778_v48 = vpop.xlane.xlu1 %777 }
 0x150   : > { %v779_v49 = vrot.slane %v778_v48, 4 }
 0x152   : > { %v780_v50 = vadd.f32 %v779_v49, %v778_v48 }
 0x154   : > { %v781_v51 = vrot.slane %v780_v50, 2 }
 0x156   : > { %v782_v52 = vadd.f32 %v781_v51, %v780_v50 }
 0x158   : > { %v783_v53 = vrot.slane %v782_v52, 1 }
 0x15a   : > { %v784_v54 = vadd.f32 %v783_v53, %v782_v52 }
 0x15c   : > { %1570 = vpush %v784_v54 }
 0x177   : > { %v1477_v36 = vpop.f32.mrb[0].mxu0 }
 0x178   : > { %v536_v37 = vpop.f32.mrb[1].mxu0  ;;  %v555_v40 = vsel %vm2019_vm6, %v1477_v36, %v550_v38 }
 0x179   : > { %v554_v39 = vsel %vm2019_vm6, %v536_v37, %v548_v35 }
 0x17a   : > { %1494 = vmatprep.mubr.msk.f32.mxu1 %vm2017_vm7, %v554_v39 }
 0x17b   : > { %1495 = vmatmul.mubr.msk.f32.vlgmr.msra.gmra.mrb[0].mxu1 %vm2017_vm7, %v555_v40 }
 0x18d   : > { %s1571_s16 = spop %1570 }
 0x18e   : > { %v786_v3 = vstv %s1571_s16  ;;  %s1683_s16 = smov 1  }
 0x18f   : > { %1613 = vrsqrt.f32 %v786_v3  ;;  %vm789_vm8 = vcmp.eq.f32.partialorder %v786_v3, inf  ;;  %v792_v11 = vand.u32 2147483648, %v786_v3  ;;  %vm791_vm9 = vcmp.eq.f32.partialorder %v786_v3, 0.0 }
 0x199   : > { %v1614_v10 = vpop.eup %1613 }
 0x19a   : > { %v788_v14 = vmul.f32 %v1614_v10, %v786_v3 }
 0x19c   : > { %v790_v20 = vsel %vm789_vm8, %v786_v3, %v788_v14 }
 0x19d   : > { %v793_v23 = vsel %vm791_vm9, %v792_v11, %v790_v20 }
 0x19e   : > { %1572 = vpush %v793_v23 }
 0x24e   : > { %v1496_v56 = vpop.f32.mrb[0].mxu1 }
 0x24f   : > { %v1845_v57 = vadd.f32 %v1496_v56, %v1417_v55  ;;  %v644_v58 = vpop.f32.mrb[1].mxu1 }
 0x250   : > { %v1847_v59 = vadd.f32 %v1417_v55, %v644_v58 }
 0x251   : > { %v656_v60 = vmul.f32 0.70710677, %v1845_v57  ;;  %v654_v53 = vmul.f32 0.5, %v1845_v57 }
 0x252   : > { %v655_v61 = vmul.f32 0.70710677, %v1847_v59  ;;  %v653_v55 = vmul.f32 0.5, %v1847_v59 }
 0x253   : > { %v662_v62 = vand.u32 2147483647, %v656_v60  ;;  %vm658_vm10 = vcmp.ge.f32.partialorder %v656_v60, 0.0 }
 0x254   : > { %v661_v63 = vand.u32 2147483647, %v655_v61  ;;  %vm657_vm11 = vcmp.ge.f32.partialorder %v655_v61, 0.0  ;;  %v660_v48 = vsel %vm658_vm10, 1.0, %v1679_v47 }
 0x255   : > { %v664_v0 = vmul.f32 0.3275911, %v662_v62  ;;  %v690_v8 = vsub.f32 0.0, %v662_v62  ;;  %v659_v51 = vsel %vm657_vm11, 1.0, %v1679_v47 }
 0x256   : > { %v663_v1 = vmul.f32 0.3275911, %v661_v63  ;;  %v689_v9 = vsub.f32 0.0, %v661_v63 }
 0x257   : > { %v666_v2 = vadd.f32 1.0, %v664_v0  ;;  %v692_v13 = vmul.f32 %v690_v8, %v662_v62 }
 0x258   : > { %v665_v7 = vadd.f32 1.0, %v663_v1  ;;  %v691_v17 = vmul.f32 %v689_v9, %v661_v63 }
 0x259   : > { %1615 = vrcp.f32 %v666_v2  ;;  %v695_v24 = vmul.f32 1.442695, %v692_v13  ;;  %v732_v2 = vstv %s720_s21  ;;  %s1685_s21 = smov 127  }
 0x25a   : > { %1617 = vrcp.f32 %v665_v7  ;;  %v693_v27 = vmul.f32 1.442695, %v691_v17 }
 0x25b   : > { %1619 = vpow2.f32 %v695_v24 }
 0x25c   : > { %1621 = vpow2.f32 %v693_v27 }
 0x25d   : > { %1623 = vrcp.f32 %v732_v2 }
 0x263   : > { %v1616_v12 = vpop.eup %1615 }
 0x264   : > { %v1618_v15 = vpop.eup %1617  ;;  %v672_v16 = vmul.f32 1.0614054, %v1616_v12 }
 0x265   : > { %v671_v18 = vmul.f32 1.0614054, %v1618_v15  ;;  %v1620_v41 = vpop.eup %1619 }
 0x266   : > { %v674_v21 = vadd.f32 -1.4531521, %v672_v16  ;;  %v1622_v43 = vpop.eup %1621 }
 0x267   : > { %v673_v25 = vadd.f32 -1.4531521, %v671_v18  ;;  %v1624_v10 = vpop.eup %1623 }
 0x268   : > { %v676_v26 = vmul.f32 %v1616_v12, %v674_v21 }
 0x269   : > { %v675_v28 = vmul.f32 %v1618_v15, %v673_v25 }
 0x26a   : > { %v678_v30 = vadd.f32 1.4214138, %v676_v26 }
 0x26b   : > { %v677_v31 = vadd.f32 1.4214138, %v675_v28 }
 0x26c   : > { %v680_v32 = vmul.f32 %v1616_v12, %v678_v30 }
 0x26d   : > { %v679_v33 = vmul.f32 %v1618_v15, %v677_v31 }
 0x26e   : > { %v682_v34 = vadd.f32 -0.28449672, %v680_v32  ;;  %v1420_v32 = vld [vmem:[%s422_s29] ss:$0 sm:$0xff]  ;;  %s1573_s29 = spop %1572 }
 0x26f   : > { %v681_v35 = vadd.f32 -0.28449672, %v679_v33  ;;  %v809_v47 = vstv %s1573_s29 }
 0x270   : > { %v684_v36 = vmul.f32 %v1616_v12, %v682_v34 }
 0x271   : > { %v683_v37 = vmul.f32 %v1618_v15, %v681_v35 }
 0x272   : > { %v686_v38 = vadd.f32 0.2548296, %v684_v36 }
 0x273   : > { %v685_v39 = vadd.f32 0.2548296, %v683_v37  ;;  %v1421_v37 = vld [vmem:[%s425_s13] ss:$0 sm:$0xff] }
 0x274   : > { %v688_v40 = vmul.f32 %v1616_v12, %v686_v38 }
 0x275   : > { %v687_v42 = vmul.f32 %v1618_v15, %v685_v39 }
 0x276   : > { %v698_v44 = vmul.f32 %v1620_v41, %v688_v40 }
 0x277   : > { %v697_v45 = vmul.f32 %v1622_v43, %v687_v42 }
 0x278   : > { %v700_v46 = vsub.f32 1.0, %v698_v44 }
 0x279   : > { %v699_v49 = vsub.f32 1.0, %v697_v45 }
 0x27a   : > { %v702_v50 = vmul.f32 %v700_v46, %v660_v48 }
 0x27b   : > { %v701_v52 = vmul.f32 %v699_v49, %v659_v51 }
 0x27c   : > { %v704_v54 = vadd.f32 1.0, %v702_v50 }
 0x27d   : > { %v703_v56 = vadd.f32 1.0, %v701_v52 }
 0x27e   : > { %v706_v58 = vmul.f32 %v704_v54, %v654_v53 }
 0x27f   : > { %v705_v62 = vmul.f32 %v703_v56, %v653_v55 }
 0x280   : > { %v722_v60 = vmul.f32 %v706_v58, %v1815_v22 }
 0x281   : > { %v721_v61 = vmul.f32 %v705_v62, %v1811_v19 }
 0x282   : > { %v724_v63 = vsel %vm2019_vm6, %v722_v60, 0.0  ;;  %v1552_v60 = vpack.c.bf16 %v1798_v6, %v1793_v4 }
 0x283   : > { %v723_v0 = vsel %vm2019_vm6, %v721_v61, 0.0 }
 0x284   : > { %v725_v1 = vadd.f32 %v724_v63, %v723_v0 }
 0x286   : > { %v726_v57 = vrot.slane %v725_v1, 4 }
 0x288   : > { %v727_v3 = vadd.f32 %v726_v57, %v725_v1 }
 0x28a   : > { %v728_v59 = vrot.slane %v727_v3, 2 }
 0x28c   : > { %v729_v7 = vadd.f32 %v728_v59, %v727_v3  ;;  %v884_v3 = vld [vmem:[%s2006_s1] sm:$0xff] }
 0x28e   : > { %v730_v8 = vrot.slane %v729_v7, 1 }
 0x290   : > { %v731_v9 = vadd.f32 %v730_v8, %v729_v7  ;;  %v885_v7 = vld [vmem:[%s2006_s1 + $0x8] sm:$0xff] }
 0x292   : > { %v734_v11 = vmul.f32 %v1624_v10, %v731_v9 }
 0x294   : > { %v736_v12 = vsub.f32 %v706_v58, %v734_v11  ;;  %v735_v13 = vsub.f32 %v705_v62, %v734_v11  ;;  %v1681_v62 = vmov 1.0|1.0  }
 0x295   : > { %1550 = vmatprep.subr.bf16.mxu0 %v1681_v62 }
 0x296   : > { %v738_v14 = vmul.f32 %v736_v12, %v1815_v22  ;;  %v737_v15 = vmul.f32 %v735_v13, %v1811_v19  ;;  %v796_v22 = vlaneseq  ;;  %v758_v34 = vmul.f32 %v1420_v32, %v735_v13  ;;  %1551 = vmatpush3.bf16.msra.mxu0 %v1681_v62 }
 0x297   : > { %v759_v35 = vmul.f32 %v1420_v32, %v736_v12  ;;  %1553 = vmatprep.subr.bf16.mxu0 %v1552_v60 }
 0x298   : > { %v740_v16 = vmul.f32 %v738_v14, %v738_v14  ;;  %v739_v17 = vmul.f32 %v737_v15, %v737_v15  ;;  %v1865_v19 = vshrl.u32 %v796_v22, 7  ;;  %v855_v63 = vand.u32 127, %v796_v22 }
 0x29a   : > { %v741_v18 = vsel %vm2019_vm6, %v739_v17, 0.0  ;;  %v742_v20 = vsel %vm2019_vm6, %v740_v16, 0.0  ;;  %v798_v33 = vsub.s32 0, %v1865_v19  ;;  %v853_v1 = vadd.s32 8, %v1865_v19 }
 0x29b   : > { %v743_v21 = vadd.f32 %v742_v20, %v741_v18  ;;  %vm876_vm14 = vcmp.lt.s32.totalorder %v855_v63, %v1865_v19  ;;  %vm856_vm15 = vcmp.ne.s32.totalorder %v855_v63, %v1865_v19  ;;  %v1682_v17 = vmov 0.0   ;;  %v1144_v20 = vld [vmem:[%s2008_s3 + $0x8] sm:$0xff] }
 0x29c   : > { %v799_v39 = vrot.slane %v1827_v29, %v798_v33  ;;  %vm877_vm9 = vcmp.lt.s32.totalorder %v855_v63, %v853_v1 }
 0x29d   : > { %v744_v23 = vrot.slane %v743_v21, 4 }
 0x29f   : > { %v745_v24 = vadd.f32 %v744_v23, %v743_v21 }
 0x2a1   : > { %v746_v25 = vrot.slane %v745_v24, 2 }
 0x2a3   : > { %v747_v26 = vadd.f32 %v746_v25, %v745_v24  ;;  %v1143_v24 = vld [vmem:[%s2008_s3] sm:$0xff] }
 0x2a5   : > { %v748_v27 = vrot.slane %v747_v26, 1 }
 0x2a7   : > { %v749_v28 = vadd.f32 %v748_v27, %v747_v26 }
 0x2a9   : > { %v750_v30 = vmul.f32 %v1624_v10, %v749_v28 }
 0x2ab   : > { %v760_v31 = vadd.f32 1e-05, %v750_v30 }
 0x2ad   : > { %1625 = vrsqrt.f32 %v760_v31 }
 0x2ae   : > { %1627 = vrcp.f32 %v809_v47 }
 0x2b7   : > { %v1626_v36 = vpop.eup %1625 }
 0x2b8   : > { %v762_v38 = vmul.f32 %v1626_v36, %v758_v34  ;;  %v763_v40 = vmul.f32 %v1626_v36, %v759_v35  ;;  %v1628_v48 = vpop.eup %1627 }
 0x2ba   : > { %v771_v41 = vadd.f32 %v1421_v37, %v762_v38  ;;  %v772_v42 = vadd.f32 %v1421_v37, %v763_v40 }
 0x2bc   : > { %v801_v43 = vmul.f32 %v799_v39, %v771_v41  ;;  %v802_v45 = vmul.f32 %v799_v39, %v772_v42 }
 0x2be   : > { %v803_v44 = vsel %vm2019_vm6, %v801_v43, 0.0  ;;  %v806_v46 = vsel %vm2019_vm6, %v802_v45, 0.0 }
 0x2bf   : > { %804 = vadd.xlane.f32.xlu0 %v803_v44 }
 0x2c3   : > { %807 = vadd.xlane.f32.xlu0 %v806_v46 }
 0x34c   : > { %v805_v49 = vpop.xlane.xlu0 %804 }
 0x34d   : > { %v811_v50 = vmul.f32 %v1628_v48, %v805_v49 }
 0x34f   : > { %1629 = vtanh.f32 %v811_v50 }
 0x350   : > { %v808_v51 = vpop.xlane.xlu0 %807 }
 0x351   : > { %v812_v29 = vmul.f32 %v1628_v48, %v808_v51 }
 0x353   : > { %1631 = vtanh.f32 %v812_v29 }
 0x359   : > { %v1630_v52 = vpop.eup %1629 }
 0x35a   : > { %v1882_v53 = vmul.f32 %v1630_v52, %v771_v41  ;;  %v817_v54 = vsel %vm815_vm12, %v1630_v52, -3.0 }
 0x35b   : > { %864 = vperm.xlu1 %1608, %v817_v54  }
 0x35c   : > { %1064 = vst.msk [vmem:[#allocation2] sm:$0xff] %vm2019_vm6, %v1882_v53 }
 0x35d   : > { %v1632_v55 = vpop.eup %1631 }
 0x35e   : > { %v1887_v56 = vmul.f32 %v1632_v55, %v772_v42  ;;  %v818_v58 = vsel %vm816_vm13, %v1632_v55, -3.0  ;;  %vm857_vm13 = vcmp.ne.s32.totalorder %v855_v63, %v853_v1 }
 0x35f   : > { %869 = vperm.xlu0 %1607, %v818_v58  }
 0x360   : > { %1065 = vst.msk [vmem:[#allocation2 + $0x8] sm:$0xff] %vm2019_vm6, %v1887_v56 }
 0x384   : > { %819 = vxpose.xlu1.b32.start [1/2] (short) (narrow) %v817_v54, 8 }
 0x388   : > { %820 = vxpose.xlu1.b32.end [2/2] (short) (narrow) %v818_v58, 8 }
 0x3da   : > { %v865_v61 = vpop.permute.xlu1 %864 }
 0x3de   : > { %v870_v57 = vpop.permute.xlu0 %869 }
 0x404   : > { %v835_v0 = vpop.trf.xlu1 }
 0x405   : > { %v861_v2 = vrot.slane %v835_v0, %v798_v33 }
 0x407   : > { %vm872_vm0 = vcmp.gt.f32.partialorder %v861_v2, %v865_v61  ;;  %vm874_vm1 = vcmp.eq.f32.partialorder %v861_v2, %v865_v61  ;;  %vm875_vm2 = vcmp.eq.f32.partialorder %v861_v2, %v870_v57  ;;  %vm873_vm10 = vcmp.gt.f32.partialorder %v861_v2, %v870_v57  ;;  %v1132_v2 = vld [vmem:[#allocation4] sm:$0x1] }
 0x408   : > { %vm878_vm8 = vmand %vm874_vm1, %vm876_vm14  ;;  %vm2020_vm1 = vcmask 261120  }
 0x409   : > { %vm880_vm11 = vmor %vm872_vm0, %vm878_vm8  ;;  %vm2022_vm8 = vcmask 253952  }
 0x40a   : > { %vm882_vm12 = vmand %vm856_vm15, %vm880_vm11 }
 0x40b   : > { %v886_v59 = vsel %vm882_vm12, %v884_v3, 0.0  ;;  %vm879_vm7 = vmand %vm875_vm2, %vm877_vm9 }
 0x40c   : > { %1501 = vmatprep.mubr.msk.f32.mxu0 %vm463_vm3, %v886_v59  ;;  %vm881_vm5 = vmor %vm873_vm10, %vm879_vm7 }
 0x40d   : > { %vm883_vm6 = vmand %vm857_vm13, %vm881_vm5 }
 0x40e   : > { %v887_v8 = vsel %vm883_vm6, %v885_v7, 0.0  ;;  %vm2021_vm2 = vmmov %vm2020_vm1 }
 0x40f   : > { %1502 = vmatmul.mubr.msk.f32.vlgmr.msra.gmra.mrb[2].mxu0 %vm463_vm3, %v887_v8  ;;  %vm2023_vm9 = vmmov %vm2020_vm1 }
 0x410   : > { %1555 = vmatpush3.bf16.msra.mxu0 %v1552_v60  ;;  %1508 = vmatprep.mubr.msk.f32.mxu0 %vm463_vm3, %v884_v3  ;;  %vm2024_vm10 = vmmov %vm2020_vm1 }
 0x411   : > { %vm2025_vm13 = vmmov %vm2020_vm1 }
 0x413   : > { %1509 = vmatmul.mubr.msk.f32.vlgmr.msra.gmra.mrb[4].mxu0 %vm463_vm3, %v885_v7 }
 0x4e2   : > { %v1503_v9 = vpop.f32.mrb[2].mxu0 }
 0x4e3   : > { %v960_v10 = vpop.f32.mrb[3].mxu0 }
 0x4e6   : > { %v1510_v11 = vpop.f32.mrb[4].mxu0 }
 0x4e7   : > { %v1051_v12 = vmul.f32 0.5, %v1510_v11  ;;  %v1041_v13 = vpop.f32.mrb[5].mxu0 }
 0x4e8   : > { %v1050_v14 = vmul.f32 0.5, %v1041_v13 }
 0x4e9   : > { %v1053_v15 = vceil.f32 %v1051_v12 }
 0x4ea   : > { %v1052_v16 = vceil.f32 %v1050_v14 }
 0x4eb   : > { %vm1055_vm14 = vcmp.lt.f32.partialorder %v1503_v9, %v1053_v15 }
 0x4ec   : > { %v1427_v18 = vsel %vm1055_vm14, 1.0, %v1682_v17  ;;  %vm1054_vm5 = vcmp.lt.f32.partialorder %v960_v10, %v1052_v16  ;;  %vm2026_vm14 = vmmov %vm2020_vm1 }
 0x4ed   : > { %v1426_v21 = vsel %vm1054_vm5, 1.0, %v1682_v17  ;;  %v1061_v23 = vmul.f32 %v1427_v18, %v1798_v6  ;;  %v1684_v6 = vmov 1   ;;  %vm2027_vm5 = vmmov %vm2022_vm8 }
 0x4ee   : > { %v1060_v25 = vmul.f32 %v1426_v21, %v1793_v4  ;;  %1610 = vset.pattern.permute.xlu1 %v1684_v6 }
 0x4ef   : > { %1067 = vst.msk [vmem:[#allocation3 + $0x8] sm:$0xff] %vm707_vm4, %v1061_v23  ;;  %v1071_v26 = vmul.f32 %v1144_v20, %v1061_v23 }
 0x4f0   : > { %1147 = vrot.lane.b32.xlu0 %v1060_v25, %s1683_s16  ;;  %1066 = vst.msk [vmem:[#allocation3] sm:$0xff] %vm707_vm4, %v1060_v25  ;;  %v1070_v27 = vmul.f32 %v1143_v24, %v1060_v25 }
 0x4f1   : > { %v1096_v28 = vsel %vm707_vm4, %v1071_v26, 0.0  ;;  %vm1073_vm6 = vcmp.gt.f32.partialorder %v1071_v26, 0.5 }
 0x4f2   : > { %v1095_v30 = vsel %vm707_vm4, %v1070_v27, 0.0  ;;  %vm1072_vm3 = vcmp.gt.f32.partialorder %v1070_v27, 0.5  ;;  %v1075_v34 = vsel %vm1073_vm6, 1, %v1677_v5  ;;  %vm2029_vm6 = vmmov %vm2020_vm1 }
 0x4f3   : > { %v1097_v31 = vadd.f32 %v1096_v28, %v1095_v30  ;;  %v1074_v33 = vsel %vm1072_vm3, 1, %v1677_v5  ;;  %vm2028_vm3 = vmmov %vm2020_vm1 }
 0x4f4   : > { %1149 = vrot.lane.b32.xlu0 %v1061_v23, %s1683_s16 }
 0x562   : > { %v1148_v22 = vpop.permute.xlu0 %1147 }
 0x563   : > { %v1153_v19 = vmul.f32 %v1148_v22, %v1143_v24 }
 0x565   : > { %1180 = vrot.lane.b32.xlu0 %v1153_v19, %s1685_s21  ;;  %vm1155_vm7 = vcmp.gt.f32.partialorder %v1153_v19, 0.5 }
 0x566   : > { %v1150_v4 = vpop.permute.xlu0 %1149  ;;  %v1157_v35 = vsel %vm1155_vm7, 1, %v1677_v5  ;;  %vm1141_vm7 = vcmask 516352  }
 0x567   : > { %v1154_v32 = vmul.f32 %v1150_v4, %v1144_v20 }
 0x569   : > { %1182 = vrot.lane.b32.xlu0 %v1154_v32, %s1685_s21  ;;  %vm1156_vm15 = vcmp.gt.f32.partialorder %v1154_v32, 0.5 }
 0x56a   : > { %v1158_v41 = vsel %vm1156_vm15, 1, %v1677_v5  ;;  %vm1687_vm15 = vmmov (!%p1428_p5), 0  }
 0x588   : > { %1098 = vadd.xlane.f32.xlu0 %v1097_v31 }
 0x59e   : > { %1110 = vperm.xlu0 %1607, %v1070_v27  }
 0x5a2   : > { %1115 = vperm.xlu0 %1607, %v1071_v26  }
 0x5a6   : > { %1609 = vset.pattern.permute.xlu0 %v1684_v6 }
 0x5a7   : > { %1200 = vperm.xlu0 %1609, %v1153_v19  }
 0x5ab   : > { %1611 = vset.pattern.permute.xlu0 %v1677_v5 }
 0x5ac   : > { %1077 = vperm.xlu0 %1611, %v1074_v33  }
 0x5b0   : > { %1080 = vperm.xlu0 %1611, %v1075_v34  }
 0x5b4   : > { %1612 = vset.pattern.permute.xlu0 %v1684_v6 }
 0x5b5   : > { %1160 = vperm.xlu0 %1612, %v1157_v35  }
 0x5d7   : > { %v1181_v36 = vpop.permute.xlu0 %1180 }
 0x5d8   : > { %v1186_v38 = vsel %vm707_vm4, %v1181_v36, 0.0 }
 0x5db   : > { %v1183_v37 = vpop.permute.xlu0 %1182 }
 0x5dc   : > { %v1187_v39 = vsel %vm707_vm4, %v1183_v37, 0.0 }
 0x5dd   : > { %v1188_v40 = vadd.f32 %v1187_v39, %v1186_v38  ;;  %v1221_v39 = vld [vmem:[#allocation4 + $0x1] sm:$0x1] }
 0x5df   : > { %1189 = vadd.xlane.f32.xlu1 %v1188_v40 }
 0x5f0   : > { %1204 = vperm.xlu1 %1610, %v1154_v32  }
 0x5f4   : > { %1163 = vperm.xlu1 %1610, %v1158_v41  }
 0x615   : > { %v1099_v42 = vpop.xlane.xlu0 %1098 }
 0x616   : > { %v1100_v43 = vrot.slane %v1099_v42, 4 }
 0x618   : > { %v1101_v44 = vadd.f32 %v1100_v43, %v1099_v42 }
 0x61a   : > { %v1102_v45 = vrot.slane %v1101_v44, 2 }
 0x61c   : > { %v1103_v46 = vadd.f32 %v1102_v45, %v1101_v44 }
 0x61d   : > { %v1111_v47 = vpop.permute.xlu0 %1110 }
 0x61e   : > { %v1104_v48 = vrot.slane %v1103_v46, 1  ;;  %v1118_v7 = vmul.f32 %v1111_v47, %v1882_v53 }
 0x620   : > { %v1105_v49 = vadd.f32 %v1104_v48, %v1103_v46  ;;  %v1120_v9 = vsel %vm2024_vm10, %v1118_v7, 0.0  ;;  %v1240_v7 = vld [vmem:[%s2014_s9 + $0x20] sm:$0xff] (!%p1428_p5) }
 0x621   : > { %v1116_v50 = vpop.permute.xlu0 %1115 }
 0x622   : > { %1574 = vpush %v1105_v49  ;;  %v1119_v3 = vmul.f32 %v1116_v50, %v1887_v56 }
 0x624   : > { %v1121_v8 = vsel %vm2023_vm9, %v1119_v3, 0.0  ;;  %v1688_v3 = vmov (!%p1428_p5), 0.0  }
 0x625   : > { %v1122_v10 = vadd.f32 %v1121_v8, %v1120_v9  ;;  %1527 = vmatprep.mubr.msk.f32.mxu0 (!%p1428_p5), %vm1687_vm15, %v1688_v3  ;;  %v1241_v8 = vld [vmem:[%s2014_s9 + $0x28] sm:$0xff] (!%p1428_p5) }
 0x626   : > { %v1925_v51 = vpop.permute.xlu0 %1200  ;;  %v1563_v9 = vpack.c.bf16 (!%p1428_p5), %v1241_v8, %v1240_v7 }
 0x627   : > { %v1123_v11 = vrot.slane %v1122_v10, 4  ;;  %v1207_v43 = vmul.f32 %v1925_v51, %v1882_v53 }
 0x629   : > { %v1124_v12 = vadd.f32 %v1123_v11, %v1122_v10  ;;  %v1209_v45 = vsel %vm2029_vm6, %v1207_v43, 0.0  ;;  %v1242_v10 = vld [vmem:[%s2014_s9 + $0x30] sm:$0xff] (!%p1428_p5)  ;;  %v1243_v11 = vld [vmem:[%s2014_s9 + $0x38] sm:$0xff] (!%p1428_p5) }
 0x62b   : > { %v1078_v29 = vpop.permute.xlu0 %1077  ;;  %v1125_v13 = vrot.slane %v1124_v12, 2 }
 0x62c   : > { %vm1082_vm4 = vcmp.eq.s32.totalorder %v1078_v29, 1 }
 0x62d   : > { %v1084_v52 = vsel %vm1082_vm4, %v1882_v53, -1e+30  ;;  %v1126_v15 = vadd.f32 %v1125_v13, %v1124_v12  ;;  %v1566_v12 = vpack.c.bf16 (!%p1428_p5), %v1243_v11, %v1242_v10  ;;  %vm2030_vm4 = vcmask (!%p1428_p5), 523264  }
 0x62e   : > { %v1086_v55 = vsel %vm2020_vm1, %v1084_v52, -inf }
 0x62f   : > { %v1081_v54 = vpop.permute.xlu0 %1080  ;;  %v1127_v16 = vrot.slane %v1126_v15, 1 }
 0x630   : > { %vm1083_vm0 = vcmp.eq.s32.totalorder %v1081_v54, 1 }
 0x631   : > { %v1085_v5 = vsel %vm1083_vm0, %v1887_v56, -1e+30  ;;  %v1128_v17 = vadd.f32 %v1127_v16, %v1126_v15  ;;  %vm1324_vm0 = vcmask (!%p1428_p5), 254976  }
 0x632   : > { %v1087_v58 = vsel %vm2021_vm2, %v1085_v5, -inf }
 0x633   : > { %v1088_v62 = vmax.f32 %v1086_v55, %v1087_v58 }
 0x634   : > { %v1161_v24 = vpop.permute.xlu0 %1160 }
 0x635   : > { %v1089_v60 = vrot.slane %v1088_v62, 4  ;;  %vm1165_vm11 = vcmp.eq.s32.totalorder %v1161_v24, 1 }
 0x636   : > { %v1167_v30 = vsel %vm1165_vm11, %v1882_v53, -1e+30 }
 0x637   : > { %v1090_v61 = vmax.f32 %v1088_v62, %v1089_v60  ;;  %v1169_v19 = vsel %vm2025_vm13, %v1167_v30, -inf }
 0x639   : > { %v1091_v63 = vrot.slane %v1090_v61, 2 }
 0x63b   : > { %v1092_v0 = vmax.f32 %v1090_v61, %v1091_v63  ;;  %v1236_v61 = vld [vmem:[%s2014_s9] sm:$0xff] (!%p1428_p5)  ;;  %v1237_v63 = vld [vmem:[%s2014_s9 + $0x8] sm:$0xff] (!%p1428_p5) }
 0x63d   : > { %v1093_v1 = vrot.slane %v1092_v0, 1 }
 0x63f   : > { %v1094_v57 = vmax.f32 %v1092_v0, %v1093_v1  ;;  %v1238_v0 = vld [vmem:[%s2014_s9 + $0x10] sm:$0xff] (!%p1428_p5)  ;;  %v1686_v1 = vmov (!%p1428_p5), 0.0|0.0  }
 0x640   : > { %1556 = vmatprep.subr.bf16.mxu0 (!%p1428_p5), %v1686_v1 }
 0x641   : > { %v1133_v59 = vadd.f32 %v1132_v2, %v1094_v57  ;;  %v1557_v2 = vpack.c.bf16 (!%p1428_p5), %v1237_v63, %v1236_v61  ;;  %v1239_v57 = vld [vmem:[%s2014_s9 + $0x18] sm:$0xff] (!%p1428_p5) }
 0x643   : > { %1134 = vst.msk [vmem:[#allocation4] sm:$0x1] %vm2022_vm8, %v1133_v59  ;;  %1558 = vmatpush3.bf16.msra.mxu0 (!%p1428_p5), %v1557_v2  ;;  %v1560_v59 = vpack.c.bf16 (!%p1428_p5), %v1239_v57, %v1238_v0 }
 0x644   : > { %1559 = vmatprep.subr.bf16.mxu0 (!%p1428_p5), %v1686_v1 }
 0x647   : > { %1561 = vmatpush3.bf16.msra.mxu0 (!%p1428_p5), %v1560_v59 }
 0x648   : > { %1562 = vmatprep.subr.bf16.mxu0 (!%p1428_p5), %v1686_v1 }
 0x64a   : > { %v1135_v51 = vld [vmem:[#allocation4] sm:$0x1] }
 0x64b   : > { %1564 = vmatpush3.bf16.msra.mxu0 (!%p1428_p5), %v1563_v9 }
 0x64c   : > { %1565 = vmatprep.subr.bf16.mxu0 (!%p1428_p5), %v1686_v1 }
 0x64f   : > { %1567 = vmatpush3.bf16.msra.mxu0 (!%p1428_p5), %v1566_v12 }
 0x653   : > { %s1575_s22 = spop %1574 }
 0x654   : > { %s1107_s20 = smax.f32 %s1680_s23, %s1575_s22 }
 0x655   : > { %v1129_v14 = vstv %s1107_s20 }
 0x656   : > { %1633 = vrcp.f32 %v1129_v14  ;;  %v1429_v14 = vld [vmem:[%s2015_s10] ss:$0 sm:$0xff] (!%p1428_p5) }
 0x660   : > { %v1634_v18 = vpop.eup %1633 }
 0x661   : > { %v1131_v20 = vmul.f32 %v1634_v18, %v1128_v17 }
 0x663   : > { %1137 = vrot.lane.b32.xlu1 %v1131_v20, %s1678_s28 }
 0x66c   : > { %v1190_v21 = vpop.xlane.xlu1 %1189 }
 0x66d   : > { %v1191_v23 = vrot.slane %v1190_v21, 4 }
 0x66f   : > { %v1192_v25 = vadd.f32 %v1191_v23, %v1190_v21 }
 0x670   : > { %v1205_v26 = vpop.permute.xlu1 %1204 }
 0x671   : > { %v1193_v27 = vrot.slane %v1192_v25, 2  ;;  %v1208_v42 = vmul.f32 %v1205_v26, %v1887_v56 }
 0x673   : > { %v1194_v28 = vadd.f32 %v1193_v27, %v1192_v25  ;;  %v1210_v44 = vsel %vm2028_vm3, %v1208_v42, 0.0 }
 0x674   : > { %v1164_v31 = vpop.permute.xlu1 %1163  ;;  %v1211_v46 = vadd.f32 %v1210_v44, %v1209_v45 }
 0x675   : > { %vm1166_vm12 = vcmp.eq.s32.totalorder %v1164_v31, 1  ;;  %v1195_v6 = vrot.slane %v1194_v28, 1 }
 0x676   : > { %v1168_v22 = vsel %vm1166_vm12, %v1887_v56, -1e+30  ;;  %v1212_v47 = vrot.slane %v1211_v46, 4 }
 0x677   : > { %v1170_v4 = vsel %vm2026_vm14, %v1168_v22, -inf  ;;  %v1196_v32 = vadd.f32 %v1195_v6, %v1194_v28 }
 0x678   : > { %v1171_v33 = vmax.f32 %v1169_v19, %v1170_v4  ;;  %v1213_v48 = vadd.f32 %v1212_v47, %v1211_v46 }
 0x679   : > { %1576 = vpush %v1196_v32 }
 0x67a   : > { %v1172_v34 = vrot.slane %v1171_v33, 4  ;;  %v1214_v49 = vrot.slane %v1213_v48, 2 }
 0x67c   : > { %v1173_v35 = vmax.f32 %v1171_v33, %v1172_v34  ;;  %v1215_v29 = vadd.f32 %v1214_v49, %v1213_v48 }
 0x67e   : > { %v1174_v36 = vrot.slane %v1173_v35, 2  ;;  %v1216_v52 = vrot.slane %v1215_v29, 1 }
 0x680   : > { %v1175_v37 = vmax.f32 %v1173_v35, %v1174_v36  ;;  %v1217_v54 = vadd.f32 %v1216_v52, %v1215_v29 }
 0x682   : > { %v1176_v38 = vrot.slane %v1175_v37, 1 }
 0x684   : > { %v1177_v40 = vmax.f32 %v1175_v37, %v1176_v38 }
 0x686   : > { %v1222_v41 = vadd.f32 %v1221_v39, %v1177_v40 }
 0x688   : > { %1223 = vst.msk [vmem:[#allocation4 + $0x1] sm:$0x1] %vm2027_vm5, %v1222_v41 }
 0x68f   : > { %v1224_v58 = vld [vmem:[#allocation4 + $0x1] sm:$0x1] }
 0x6aa   : > { %s1577_s24 = spop %1576 }
 0x6ab   : > { %s1198_s25 = smax.f32 %s1680_s23, %s1577_s24 }
 0x6ac   : > { %v1218_v50 = vstv %s1198_s25 }
 0x6ad   : > { %1635 = vrcp.f32 %v1218_v50 }
 0x6b7   : > { %v1636_v56 = vpop.eup %1635 }
 0x6b8   : > { %v1220_v5 = vmul.f32 %v1636_v56, %v1217_v54 }
 0x6ba   : > { %1226 = vrot.lane.b32.xlu0 %v1220_v5, %s1678_s28 }
 0x6d5   : > { %v1138_v53 = vpop.permute.xlu1 %1137 }
 0x6d6   : > { %v1140_v55 = vadd.f32 %v1138_v53, %v1135_v51 }
 0x6d8   : > { %1142 = vst.msk [vmem:[#allocation4] sm:$0x1] %vm1141_vm7, %v1140_v55 }
 0x729   : > { %1234 = sbr.rel (%p1428_p5) target bundleno = 2062 (0x80e), region = 72 }
 0x72c   : > { %v1227_v62 = vpop.permute.xlu0 %1226 }
 0x72d   : > { %v1229_v60 = vadd.f32 %v1227_v62, %v1224_v58 }
 0x72f   : > { %1230 = vst.msk [vmem:[#allocation4 + $0x1] sm:$0x1] %vm1141_vm7, %v1229_v60 }
 0x736   : > { %v1235_v13 = vld [vmem:[#allocation4] sm:$0x3] }
 0x737   : > { %1528 = vmatmul.mubr.msk.f32.vlgmr.msra.gmra.mrb[0].mxu0 %vm2030_vm4, %v1235_v13 }
 0x80a   : > { %v1320_v15 = vpop.f32.mrb[0].mxu0 }
 0x80b   : > { %v1321_v16 = vadd.f32 %v1429_v14, %v1320_v15  ;;  %v1529_v17 = vpop.f32.mrb[1].mxu0 }
 0x80d   : > { %1325 = vst.msk [vmem:[#allocation5] sm:$0x3] %vm1324_vm0, %v1321_v16 }
 0x80e PF: > { %p1582_p6 = scmp.eq.s32.totalorder %s1756_s18, 3  ;;  %s1689_s29 = smov [#allocation5]  }
 0x80f   : > { %s1333_s19 = sshll.u32 %s1689_s29, 4  ;;  %s1334_s19 = int_to_ptr.vmem [resolvable:$true] %s1333_s19 }
 0x810   : > { %s1637_s13 = scalar_lea.vmem %s1334_s19, 32  ;;  %p1644_p10 = scmp.lt.s32.totalorder %s1334_s19, %s1334_s19 }
 0x811   : > { %p1638_p7 = scmp.ne.s32.totalorder %s1334_s19, %s1637_s13  ;;  %p1645_p11 = scmp.lt.s32.totalorder %s1637_s13, %s1637_s13 }
 0x813   : > { %p1639_p8 = pnand %p1638_p7, %p1582_p6  ;;  %p1646_p12 = por %p1645_p11, %p1644_p10 }
 0x815   : > { %p1640_p9 = pneg %p1639_p8 }
 0x817   : > { %p1647_p13 = pnand %p1646_p12, %p1640_p9 }
 0x819   : > { %1650 = shalt.err (!%p1647_p13)
}
 0x81a   : > { %s1651_s30 = scalar_lea.hbm %s2016_s11, 32 }
 0x81b   : > { %p1652_p0 = scmp.ne.s32.totalorder %s2016_s11, %s1651_s30  ;;  %p1657_p3 = scmp.lt.u32.totalorder %s1651_s30, %s2016_s11 }
 0x81d   : > { %p1653_p1 = pnand %p1652_p0, %p1582_p6 }
 0x81f   : > { %p1654_p2 = pneg %p1653_p1 }
 0x821   : > { %p1659_p4 = pnand %p1657_p3, %p1654_p2 }
 0x823   : > { %1662 = shalt.err (!%p1659_p4)
}
 0x824   : > { %1579 = dma.vmem_to_hbm [thread:$0]  (%p1582_p6), %s1334_s19, 32, %s2016_s11, [#allocation6]  }
 0x825   : > { %1668 = dma.done.wait (%p1582_p6), [#allocation6], 32  }
 0x826   : > { %1670 = vsyncadd (%p1582_p6), [#allocation6], 4294967264 }
 0x827 PF: > { %s22_s17 = sadd.s32 1, %s1673_s17  }
 0x828   : > { %p19_p5 = scmp.ge.s32.totalorder %s22_s17, 6  }
 0x82a   :  { %21 = sbr.rel (!%p19_p5) target bundleno = 1 (0x1), region = 111 }
 0x831   :  { %1346 = vsyncpa [#allocation6], 1 }
 0x832   :  { %1348 = vsyncpa [#allocation6 + $0x1], 1 }

</bundles_post_ra>
